<compile_context>
chip_gen: v5e
topology: v5e:2x2
jax: 0.10.0
libtpu: 0.0.40
codegen_flags: <defaults>
</compile_context>

<pallas_src>
import functools
import math

import jax
import jax.numpy as jnp
from jax.experimental import pallas as pl
from jax.experimental.pallas import tpu as pltpu


# ----------------------------------------------------------------------------
# Kernel 1: SEBlock_fc  (GAP + 3x EqualizedLinear + 2x PReLU + Sigmoid)
# ----------------------------------------------------------------------------
def _se_fc_kernel(x_ref, w1t_ref, b1_ref, a1_ref,
                  w2t_ref, b2_ref, a2_ref,
                  w3t_ref, b3_ref,
                  out_ref, acc_ref, *, inv_hw):
    """x_ref: (tb, C, t_hw) input tile; acc_ref: (tb, C) f32 GAP accumulator."""
    k = pl.program_id(1)

    @pl.when(k == 0)
    def _init():
        acc_ref[...] = jnp.zeros_like(acc_ref)

    # Partial global-average-pool: accumulate sums over the lane (spatial) axis.
    x = x_ref[...].astype(jnp.float32)
    acc_ref[...] += jnp.sum(x, axis=-1)

    @pl.when(k == pl.num_programs(1) - 1)
    def _finalize():
        gap = acc_ref[...] * inv_hw                                    # (tb, C)
        # fcs[0]: EqualizedLinear (weight pre-transposed on host) + PReLU
        y = jnp.dot(gap, w1t_ref[...], preferred_element_type=jnp.float32) + b1_ref[...]
        y = jnp.where(y >= 0.0, y, a1_ref[...] * y)
        # fcs[1]: EqualizedLinear + PReLU
        y = jnp.dot(y, w2t_ref[...], preferred_element_type=jnp.float32) + b2_ref[...]
        y = jnp.where(y >= 0.0, y, a2_ref[...] * y)
        # fc_out, then Sigmoid — single full-block store.
        y = jnp.dot(y, w3t_ref[...], preferred_element_type=jnp.float32) + b3_ref[...]
        out_ref[...] = jax.nn.sigmoid(y).astype(out_ref.dtype)


def _pick_batch_tile(batch, max_batch_tile):
    """Full batch, or the largest 8-divisible divisor (keeps (8,128) rule)."""
    if batch <= max_batch_tile:
        return batch
    tb = batch
    d = 8
    while d <= min(batch - 1, max_batch_tile):
        if batch % d == 0:
            tb = d
        d += 8
    return tb


def _pick_hw_tile(hw, tb, C, dtype_bytes, max_hw_tile):
    """Lane tile: multiple of 128, bounded so a double-buffered x tile stays
    far below the v7x scoped-VMEM limit (~4 MiB per buffer budget)."""
    hw_pad128 = pl.cdiv(hw, 128) * 128
    budget = max(128, (4 * 1024 * 1024) // max(1, tb * C * dtype_bytes))
    t_hw = max(128, min((max_hw_tile // 128) * 128,
                        (budget // 128) * 128,
                        hw_pad128))
    return t_hw


def se_block_fc(x, params, *, max_hw_tile=1024, max_batch_tile=64):
    """x: (B, C, H, W); params: dict of weights/biases/prelu alphas.
    Returns the SE gate with shape (B, C, 1, 1), matching SEBlock_fc.forward."""
    B, C, H, W = x.shape
    hw = H * W
    dtype_bytes = jnp.dtype(x.dtype).itemsize

    tb = _pick_batch_tile(B, max_batch_tile)
    t_hw = _pick_hw_tile(hw, tb, C, dtype_bytes, max_hw_tile)

    hw_padded = pl.cdiv(hw, t_hw) * t_hw
    x_flat = x.reshape(B, C, hw)
    if hw_padded != hw:
        # Zero padding does not change the accumulated sum; the kernel divides
        # by the true H*W. (Power-of-two spatial sizes never hit this branch.)
        x_flat = jnp.pad(x_flat, ((0, 0), (0, 0), (0, hw_padded - hw)))

    grid = (B // tb, hw_padded // t_hw)

    # Pre-transpose the (C, C) weights on the host (free) so the kernel does
    # y @ Wt directly on the MXU.
    w1t = params["w1"].T
    w2t = params["w2"].T
    w3t = params["w3"].T

    full2 = lambda shape: pl.BlockSpec(shape, lambda i, k: (0, 0))

    tile_bytes = tb * C * t_hw * dtype_bytes
    weight_bytes = 3 * C * C * 4 + 5 * C * 4
    vmem_limit = int(min(100 * 2**20,
                         max(16 * 2**20, 4 * tile_bytes + 4 * weight_bytes)))

    kernel = functools.partial(_se_fc_kernel, inv_hw=1.0 / float(hw))

    out = pl.pallas_call(
        kernel,
        out_shape=jax.ShapeDtypeStruct((B, C), x.dtype),
        grid_spec=pltpu.PrefetchScalarGridSpec(
            num_scalar_prefetch=0,
            grid=grid,
            in_specs=[
                pl.BlockSpec((tb, C, t_hw), lambda i, k: (i, 0, k)),
                full2((C, C)), full2((1, C)), full2((1, C)),
                full2((C, C)), full2((1, C)), full2((1, C)),
                full2((C, C)), full2((1, C)),
            ],
            out_specs=pl.BlockSpec((tb, C), lambda i, k: (i, 0)),
            scratch_shapes=[pltpu.VMEM((tb, C), jnp.float32)],
        ),
        compiler_params=pltpu.CompilerParams(
            dimension_semantics=("parallel", "arbitrary"),
            vmem_limit_bytes=vmem_limit,
        ),
    )(
        x_flat,
        w1t, params["b1"], params["a1"],
        w2t, params["b2"], params["a2"],
        w3t, params["b3"],
    )
    return out.reshape(B, C, 1, 1)


# ----------------------------------------------------------------------------
# Kernel 2: SE gating multiply  (the `x * self.se(x)` in DiscriminatorBlock)
# ----------------------------------------------------------------------------
def _apply_gate_kernel(x_ref, g_ref, out_ref):
    """x_ref: (tb, C, t_hw); g_ref: (tb, C); out_ref: (tb, C, t_hw)."""
    gate = jnp.expand_dims(g_ref[...], axis=-1)            # (tb, C, 1)
    out_ref[...] = (x_ref[...] * gate).astype(out_ref.dtype)


def apply_se_gate(x, gate, *, max_hw_tile=1024, max_batch_tile=64):
    """x: (B, C, H, W); gate: (B, C, 1, 1).  Returns x * gate (broadcast)."""
    B, C, H, W = x.shape
    hw = H * W
    dtype_bytes = jnp.dtype(x.dtype).itemsize

    tb = _pick_batch_tile(B, max_batch_tile)
    t_hw = _pick_hw_tile(hw, tb, C, dtype_bytes, max_hw_tile)

    hw_padded = pl.cdiv(hw, t_hw) * t_hw
    x_flat = x.reshape(B, C, hw)
    if hw_padded != hw:
        x_flat = jnp.pad(x_flat, ((0, 0), (0, 0), (0, hw_padded - hw)))
    g_flat = gate.reshape(B, C).astype(x.dtype)

    grid = (B // tb, hw_padded // t_hw)

    tile_bytes = tb * C * t_hw * dtype_bytes
    vmem_limit = int(min(100 * 2**20,
                         max(16 * 2**20, 5 * tile_bytes + 4 * tb * C * 4)))

    out = pl.pallas_call(
        _apply_gate_kernel,
        out_shape=jax.ShapeDtypeStruct((B, C, hw_padded), x.dtype),
        grid_spec=pltpu.PrefetchScalarGridSpec(
            num_scalar_prefetch=0,
            grid=grid,
            in_specs=[
                pl.BlockSpec((tb, C, t_hw), lambda i, k: (i, 0, k)),
                pl.BlockSpec((tb, C), lambda i, k: (i, 0)),
            ],
            out_specs=pl.BlockSpec((tb, C, t_hw), lambda i, k: (i, 0, k)),
        ),
        compiler_params=pltpu.CompilerParams(
            dimension_semantics=("parallel", "arbitrary"),
            vmem_limit_bytes=vmem_limit,
        ),
    )(x_flat, g_flat)

    if hw_padded != hw:
        out = out[:, :, :hw]
    return out.reshape(B, C, H, W)


def se_block_fc_and_apply(x, params, **kw):
    """DiscriminatorBlock fragment: x * SEBlock_fc(x)."""
    gate = se_block_fc(x, params, **kw)
    return apply_se_gate(x, gate, **kw)


# ----------------------------------------------------------------------------
# Parameter init matching the PyTorch module's __init__ semantics.
# ----------------------------------------------------------------------------
def init_params(key, in_planes):
    c_scale = 1.0 / math.sqrt(in_planes)   # EqualizedWeight scale
    ks = jax.random.split(key, 3)
    # EqualizedLinear weights: N(0,1) * 1/sqrt(in_planes) (pre-scaled here).
    w1 = jax.random.normal(ks[0], (in_planes, in_planes), jnp.float32) * c_scale
    w2 = jax.random.normal(ks[1], (in_planes, in_planes), jnp.float32) * c_scale
    w3 = jax.random.normal(ks[2], (in_planes, in_planes), jnp.float32) * c_scale
    # EqualizedLinear bias: normal * 0.0 == zeros.
    zeros = jnp.zeros((1, in_planes), jnp.float32)
    # PReLU per-channel alpha, PyTorch default init 0.25.
    alpha = jnp.full((1, in_planes), 0.25, jnp.float32)
    return {
        "w1": w1, "b1": zeros, "a1": alpha,
        "w2": w2, "b2": zeros, "a2": alpha,
        "w3": w3, "b3": zeros,
    }


def _reference_se(x, params):
    """Pure-JAX reference of SEBlock_fc.forward."""
    B, C, H, W = x.shape
    y = jnp.mean(x, axis=(2, 3))
    y = y @ params["w1"].T + params["b1"]
    y = jnp.where(y >= 0, y, params["a1"] * y)
    y = y @ params["w2"].T + params["b2"]
    y = jnp.where(y >= 0, y, params["a2"] * y)
    y = y @ params["w3"].T + params["b3"]
    return jax.nn.sigmoid(y).reshape(B, C, 1, 1)


if __name__ == "__main__":
    key = jax.random.PRNGKey(0)
    k_x1, k_p1, k_x2, k_p2 = jax.random.split(key, 4)

    # Test 1: small module-consistent shape, default tiling (single HW step),
    # plus the fused SE gating multiply.
    B, C, H, W = 2, 4, 16, 16
    x = jax.random.normal(k_x1, (B, C, H, W), jnp.float32)
    params = init_params(k_p1, C)
    out = jax.block_until_ready(se_block_fc(x, params))
    ref = _reference_se(x, params)
    assert out.shape == (B, C, 1, 1)
    assert jnp.allclose(out, ref, atol=1e-5, rtol=1e-5)

    gated = jax.block_until_ready(se_block_fc_and_apply(x, params))
    assert gated.shape == (B, C, H, W)
    assert jnp.allclose(gated, x * ref, atol=1e-5, rtol=1e-5)

    # Test 2: force the multi-step accumulation path (batch tiling + HW tiling,
    # grid = (2, 2)) to exercise the @pl.when init / finalize logic.
    B2, C2, H2, W2 = 16, 8, 16, 16
    x2 = jax.random.normal(k_x2, (B2, C2, H2, W2), jnp.float32)
    params2 = init_params(k_p2, C2)
    out2 = jax.block_until_ready(
        se_block_fc(x2, params2, max_hw_tile=128, max_batch_tile=8))
    ref2 = _reference_se(x2, params2)
    assert out2.shape == (B2, C2, 1, 1)
    assert jnp.allclose(out2, ref2, atol=1e-5, rtol=1e-5)

    gated2 = jax.block_until_ready(
        apply_se_gate(x2, out2, max_hw_tile=128, max_batch_tile=8))
    assert gated2.shape == (B2, C2, H2, W2)
    assert jnp.allclose(gated2, x2 * ref2, atol=1e-5, rtol=1e-5)

    print("KERNEL_OK")
</pallas_src>

<mosaic_0001>
module attributes {stable_mosaic.version = 11 : i64} {
  func.func @_se_fc_kernel(%arg0: i32, %arg1: i32, %arg2: memref<2x4x256xf32, #tpu.memory_space<vmem>>, %arg3: memref<4x4xf32, #tpu.memory_space<vmem>>, %arg4: memref<1x4xf32, #tpu.memory_space<vmem>>, %arg5: memref<1x4xf32, #tpu.memory_space<vmem>>, %arg6: memref<4x4xf32, #tpu.memory_space<vmem>>, %arg7: memref<1x4xf32, #tpu.memory_space<vmem>>, %arg8: memref<1x4xf32, #tpu.memory_space<vmem>>, %arg9: memref<4x4xf32, #tpu.memory_space<vmem>>, %arg10: memref<1x4xf32, #tpu.memory_space<vmem>>, %arg11: memref<2x4xf32, #tpu.memory_space<vmem>>, %arg12: memref<2x4xf32, #tpu.memory_space<vmem>>) attributes {dimension_semantics = [#tpu.dimension_semantics<parallel>, #tpu.dimension_semantics<arbitrary>], iteration_bounds = array<i64: 1, 1>, scalar_prefetch = 0 : i64, scratch_operands = 1 : i64, tpu.core_type = #tpu.core_type<tc>, window_params = [{transform_indices = @transform_0, window_bounds = array<i64: 2, 4, 256>}, {pipeline_mode = #tpu.pipeline_mode<synchronous>, transform_indices = @transform_1, window_bounds = array<i64: 4, 4>}, {pipeline_mode = #tpu.pipeline_mode<synchronous>, transform_indices = @transform_2, window_bounds = array<i64: 1, 4>}, {pipeline_mode = #tpu.pipeline_mode<synchronous>, transform_indices = @transform_3, window_bounds = array<i64: 1, 4>}, {pipeline_mode = #tpu.pipeline_mode<synchronous>, transform_indices = @transform_4, window_bounds = array<i64: 4, 4>}, {pipeline_mode = #tpu.pipeline_mode<synchronous>, transform_indices = @transform_5, window_bounds = array<i64: 1, 4>}, {pipeline_mode = #tpu.pipeline_mode<synchronous>, transform_indices = @transform_6, window_bounds = array<i64: 1, 4>}, {pipeline_mode = #tpu.pipeline_mode<synchronous>, transform_indices = @transform_7, window_bounds = array<i64: 4, 4>}, {pipeline_mode = #tpu.pipeline_mode<synchronous>, transform_indices = @transform_8, window_bounds = array<i64: 1, 4>}, {transform_indices = @transform_9, window_bounds = array<i64: 2, 4>}]} {
    %c0_i32 = arith.constant 0 : i32
    %0 = arith.cmpi eq, %arg1, %c0_i32 : i32
    %1 = arith.extui %0 : i1 to i32
    %c0_i32_0 = arith.constant 0 : i32
    %2 = arith.cmpi ne, %1, %c0_i32_0 : i32
    scf.if %2 {
      %cst_9 = arith.constant 0.000000e+00 : f32
      %11 = vector.broadcast %cst_9 : f32 to vector<2x4xf32>
      %c0_10 = arith.constant 0 : index
      %c0_11 = arith.constant 0 : index
      %12 = vector.load %arg12[%c0_10, %c0_11] : memref<2x4xf32, #tpu.memory_space<vmem>>, vector<2x4xf32>
      tpu.vector_store %arg12[%c0_10, %c0_11], %11 {strides = array<i32>} : memref<2x4xf32, #tpu.memory_space<vmem>>, vector<2x4xf32>,
    } else {
    }
    %c0 = arith.constant 0 : index
    %c0_1 = arith.constant 0 : index
    %c0_2 = arith.constant 0 : index
    %3 = vector.load %arg2[%c0, %c0_1, %c0_2] : memref<2x4x256xf32, #tpu.memory_space<vmem>>, vector<2x4x256xf32>
    %c0_3 = arith.constant 0 : index
    %c0_4 = arith.constant 0 : index
    %4 = vector.load %arg12[%c0_3, %c0_4] : memref<2x4xf32, #tpu.memory_space<vmem>>, vector<2x4xf32>
    %cst = arith.constant dense<0.000000e+00> : vector<2x4xf32>
    %5 = vector.multi_reduction <add>, %3, %cst [2] : vector<2x4x256xf32> to vector<2x4xf32>
    %6 = arith.addf %4, %5 : vector<2x4xf32>
    %c0_5 = arith.constant 0 : index
    %c0_6 = arith.constant 0 : index
    %7 = vector.load %arg12[%c0_5, %c0_6] : memref<2x4xf32, #tpu.memory_space<vmem>>, vector<2x4xf32>
    tpu.vector_store %arg12[%c0_5, %c0_6], %6 {strides = array<i32>} : memref<2x4xf32, #tpu.memory_space<vmem>>, vector<2x4xf32>,
    %c0_i32_7 = arith.constant 0 : i32
    %8 = arith.cmpi eq, %arg1, %c0_i32_7 : i32
    %9 = arith.extui %8 : i1 to i32
    %c0_i32_8 = arith.constant 0 : i32
    %10 = arith.cmpi ne, %9, %c0_i32_8 : i32
    scf.if %10 {
      %c0_9 = arith.constant 0 : index
      %c0_10 = arith.constant 0 : index
      %11 = vector.load %arg12[%c0_9, %c0_10] : memref<2x4xf32, #tpu.memory_space<vmem>>, vector<2x4xf32>
      %cst_11 = arith.constant 3.906250e-03 : f32
      %12 = vector.broadcast %cst_11 : f32 to vector<2x4xf32>
      %13 = arith.mulf %11, %12 : vector<2x4xf32>
      %c0_12 = arith.constant 0 : index
      %c0_13 = arith.constant 0 : index
      %14 = vector.load %arg3[%c0_12, %c0_13] : memref<4x4xf32, #tpu.memory_space<vmem>>, vector<4x4xf32>
      %cst_14 = arith.constant dense<0.000000e+00> : vector<2x4xf32>
      %15 = tpu.matmul %13, %14, %cst_14 {dimension_numbers = #tpu.dot_dimension_numbers<[1], [0], [0], [1], [0, 0, 1, 1], [], []>} : vector<2x4xf32>, vector<4x4xf32>, vector<2x4xf32> -> vector<2x4xf32>
      %c0_15 = arith.constant 0 : index
      %c0_16 = arith.constant 0 : index
      %16 = vector.load %arg4[%c0_15, %c0_16] : memref<1x4xf32, #tpu.memory_space<vmem>>, vector<1x4xf32>
      %17 = vector.broadcast %16 : vector<1x4xf32> to vector<2x4xf32>
      %18 = arith.addf %15, %17 : vector<2x4xf32>
      %cst_17 = arith.constant 0.000000e+00 : f32
      %19 = vector.broadcast %cst_17 : f32 to vector<2x4xf32>
      %20 = arith.cmpf oge, %18, %19 : vector<2x4xf32>
      %c0_18 = arith.constant 0 : index
      %c0_19 = arith.constant 0 : index
      %21 = vector.load %arg5[%c0_18, %c0_19] : memref<1x4xf32, #tpu.memory_space<vmem>>, vector<1x4xf32>
      %22 = vector.broadcast %21 : vector<1x4xf32> to vector<2x4xf32>
      %23 = arith.mulf %22, %18 : vector<2x4xf32>
      %24 = arith.select %20, %18, %23 : vector<2x4xi1>, vector<2x4xf32>
      %c0_20 = arith.constant 0 : index
      %c0_21 = arith.constant 0 : index
      %25 = vector.load %arg6[%c0_20, %c0_21] : memref<4x4xf32, #tpu.memory_space<vmem>>, vector<4x4xf32>
      %cst_22 = arith.constant dense<0.000000e+00> : vector<2x4xf32>
      %26 = tpu.matmul %24, %25, %cst_22 {dimension_numbers = #tpu.dot_dimension_numbers<[1], [0], [0], [1], [0, 0, 1, 1], [], []>} : vector<2x4xf32>, vector<4x4xf32>, vector<2x4xf32> -> vector<2x4xf32>
      %c0_23 = arith.constant 0 : index
      %c0_24 = arith.constant 0 : index
      %27 = vector.load %arg7[%c0_23, %c0_24] : memref<1x4xf32, #tpu.memory_space<vmem>>, vector<1x4xf32>
      %28 = vector.broadcast %27 : vector<1x4xf32> to vector<2x4xf32>
      %29 = arith.addf %26, %28 : vector<2x4xf32>
      %cst_25 = arith.constant 0.000000e+00 : f32
      %30 = vector.broadcast %cst_25 : f32 to vector<2x4xf32>
      %31 = arith.cmpf oge, %29, %30 : vector<2x4xf32>
      %c0_26 = arith.constant 0 : index
      %c0_27 = arith.constant 0 : index
      %32 = vector.load %arg8[%c0_26, %c0_27] : memref<1x4xf32, #tpu.memory_space<vmem>>, vector<1x4xf32>
      %33 = vector.broadcast %32 : vector<1x4xf32> to vector<2x4xf32>
      %34 = arith.mulf %33, %29 : vector<2x4xf32>
      %35 = arith.select %31, %29, %34 : vector<2x4xi1>, vector<2x4xf32>
      %c0_28 = arith.constant 0 : index
      %c0_29 = arith.constant 0 : index
      %36 = vector.load %arg9[%c0_28, %c0_29] : memref<4x4xf32, #tpu.memory_space<vmem>>, vector<4x4xf32>
      %cst_30 = arith.constant dense<0.000000e+00> : vector<2x4xf32>
      %37 = tpu.matmul %35, %36, %cst_30 {dimension_numbers = #tpu.dot_dimension_numbers<[1], [0], [0], [1], [0, 0, 1, 1], [], []>} : vector<2x4xf32>, vector<4x4xf32>, vector<2x4xf32> -> vector<2x4xf32>
      %c0_31 = arith.constant 0 : index
      %c0_32 = arith.constant 0 : index
      %38 = vector.load %arg10[%c0_31, %c0_32] : memref<1x4xf32, #tpu.memory_space<vmem>>, vector<1x4xf32>
      %39 = vector.broadcast %38 : vector<1x4xf32> to vector<2x4xf32>
      %40 = arith.addf %37, %39 : vector<2x4xf32>
      %41 = arith.negf %40 : vector<2x4xf32>
      %42 = math.exp %41 : vector<2x4xf32>
      %cst_33 = arith.constant 1.000000e+00 : f32
      %43 = vector.broadcast %cst_33 : f32 to vector<2x4xf32>
      %44 = arith.addf %43, %42 : vector<2x4xf32>
      %45 = arith.divf %43, %44 : vector<2x4xf32>
      %c0_34 = arith.constant 0 : index
      %c0_35 = arith.constant 0 : index
      %46 = vector.load %arg11[%c0_34, %c0_35] : memref<2x4xf32, #tpu.memory_space<vmem>>, vector<2x4xf32>
      tpu.vector_store %arg11[%c0_34, %c0_35], %45 {strides = array<i32>} : memref<2x4xf32, #tpu.memory_space<vmem>>, vector<2x4xf32>,
    } else {
    }
    return
  }
  func.func @transform_0(%arg0: i32, %arg1: i32) -> (i32, i32, i32) {
    %c0_i32 = arith.constant 0 : i32
    %c0_i32_0 = arith.constant 0 : i32
    return %arg0, %c0_i32, %arg1 : i32, i32, i32
  }
  func.func @transform_1(%arg0: i32, %arg1: i32) -> (i32, i32) {
    %c0_i32 = arith.constant 0 : i32
    %c0_i32_0 = arith.constant 0 : i32
    %c0_i32_1 = arith.constant 0 : i32
    return %c0_i32, %c0_i32_0 : i32, i32
  }
  func.func @transform_2(%arg0: i32, %arg1: i32) -> (i32, i32) {
    %c0_i32 = arith.constant 0 : i32
    %c0_i32_0 = arith.constant 0 : i32
    %c0_i32_1 = arith.constant 0 : i32
    return %c0_i32, %c0_i32_0 : i32, i32
  }
  func.func @transform_3(%arg0: i32, %arg1: i32) -> (i32, i32) {
    %c0_i32 = arith.constant 0 : i32
    %c0_i32_0 = arith.constant 0 : i32
    %c0_i32_1 = arith.constant 0 : i32
    return %c0_i32, %c0_i32_0 : i32, i32
  }
  func.func @transform_4(%arg0: i32, %arg1: i32) -> (i32, i32) {
    %c0_i32 = arith.constant 0 : i32
    %c0_i32_0 = arith.constant 0 : i32
    %c0_i32_1 = arith.constant 0 : i32
    return %c0_i32, %c0_i32_0 : i32, i32
  }
  func.func @transform_5(%arg0: i32, %arg1: i32) -> (i32, i32) {
    %c0_i32 = arith.constant 0 : i32
    %c0_i32_0 = arith.constant 0 : i32
    %c0_i32_1 = arith.constant 0 : i32
    return %c0_i32, %c0_i32_0 : i32, i32
  }
  func.func @transform_6(%arg0: i32, %arg1: i32) -> (i32, i32) {
    %c0_i32 = arith.constant 0 : i32
    %c0_i32_0 = arith.constant 0 : i32
    %c0_i32_1 = arith.constant 0 : i32
    return %c0_i32, %c0_i32_0 : i32, i32
  }
  func.func @transform_7(%arg0: i32, %arg1: i32) -> (i32, i32) {
    %c0_i32 = arith.constant 0 : i32
    %c0_i32_0 = arith.constant 0 : i32
    %c0_i32_1 = arith.constant 0 : i32
    return %c0_i32, %c0_i32_0 : i32, i32
  }
  func.func @transform_8(%arg0: i32, %arg1: i32) -> (i32, i32) {
    %c0_i32 = arith.constant 0 : i32
    %c0_i32_0 = arith.constant 0 : i32
    %c0_i32_1 = arith.constant 0 : i32
    return %c0_i32, %c0_i32_0 : i32, i32
  }
  func.func @transform_9(%arg0: i32, %arg1: i32) -> (i32, i32) {
    %c0_i32 = arith.constant 0 : i32
    %c0_i32_0 = arith.constant 0 : i32
    return %arg0, %c0_i32 : i32, i32
  }
}

</mosaic_0001>

<bundles_post_ra>
// kernel: tpu_custom_call.1
= control target key start
LH: loop header
LB: loop body
LE: loop exit
PB: predicated region body
PF: predicated region fallthrough
CT: control target
= control target key end

     0   :  { %14 = vsyncpa [#allocation4], 0  ;;  %s579_s0 = inlined_call_operand.hbm [shape: f32[2,4,256], index: 0, kind: input, shape index: {}]   ;;  %s580_s1 = inlined_call_operand.hbm [shape: f32[4,4], index: 1, kind: input, shape index: {}]   ;;  %s581_s2 = inlined_call_operand.vmem [shape: f32[1,4], index: 2, kind: input, shape index: {}]   ;;  %s582_s3 = inlined_call_operand.vmem [shape: f32[1,4], index: 3, kind: input, shape index: {}]   ;;  %s583_s4 = inlined_call_operand.hbm [shape: f32[4,4], index: 4, kind: input, shape index: {}]   ;;  %s584_s5 = inlined_call_operand.hbm [shape: f32[1,4], index: 5, kind: input, shape index: {}]   ;;  %s585_s6 = inlined_call_operand.hbm [shape: f32[1,4], index: 6, kind: input, shape index: {}]   ;;  %s586_s7 = inlined_call_operand.vmem [shape: f32[4,4], index: 7, kind: input, shape index: {}]   ;;  %s587_s8 = inlined_call_operand.vmem [shape: f32[1,4], index: 8, kind: input, shape index: {}]   ;;  %s588_s9 = inlined_call_operand.hbm [shape: f32[2,4], index: 9, kind: output, shape index: {}]  }
   0x1   :  { %15 = vsyncpa [#allocation7], 0 }
   0x2   :  { %16 = vsyncpa [#allocation10], 0  ;;  %s36_s11 = sshll.u32 %s580_s1, 4  ;;  %s37_s11 = int_to_ptr.hbm [resolvable:$true] %s36_s11 }
   0x3   :  { %17 = vsyncpa [#allocation5], 0  ;;  %s477_s12 = smov [#allocation6]   ;;  %s62_s16 = sshll.u32 %s584_s5, 4  ;;  %s63_s16 = int_to_ptr.hbm [resolvable:$true] %s62_s16 }
   0x4   :  { %s38_s13 = sshll.u32 %s477_s12, 4  ;;  %s478_s17 = smov [#allocation9]   ;;  %s39_s13 = int_to_ptr.vmem [resolvable:$true] %s38_s13 }
   0x5   :  { %41 = dma.hbm_to_vmem [thread:$0]  %s37_s11, 64, %s39_s13, [#allocation7]  }
   0x6   :  { %s64_s18 = sshll.u32 %s478_s17, 4  ;;  %s22_s21 = sshll.u32 %s579_s0, 4  ;;  %s65_s18 = int_to_ptr.vmem [resolvable:$true] %s64_s18  ;;  %s23_s21 = int_to_ptr.hbm [resolvable:$true] %s22_s21 }
   0x7   :  { %67 = dma.hbm_to_vmem [thread:$0]  %s63_s16, 16, %s65_s18, [#allocation10]  }
   0x8   :  { %s479_s1 = smov [#allocation3]   ;;  %s51_s25 = sshll.u32 %s583_s4, 4  ;;  %s52_s25 = int_to_ptr.hbm [resolvable:$true] %s51_s25 }
   0x9   :  { %s24_s22 = sshll.u32 %s479_s1, 4  ;;  %s480_s26 = smov 128   ;;  %s25_s22 = int_to_ptr.vmem [resolvable:$true] %s24_s22 }
   0xa   :  { %s481_s5 = smov 8   ;;  %s482_s27 = smov [#allocation8]  }
   0xb   :  { %30 = dma.hbm_to_vmem [thread:$0]  %s23_s21, 256, %s25_s22, [#allocation4], %s480_s26, %s480_s26, %s481_s5  }
   0xc   :  { %s53_s28 = sshll.u32 %s482_s27, 4  ;;  %s73_s0 = sshll.u32 %s585_s6, 4  ;;  %s54_s28 = int_to_ptr.vmem [resolvable:$true] %s53_s28  ;;  %s74_s0 = int_to_ptr.hbm [resolvable:$true] %s73_s0 }
   0xd   :  { %56 = dma.hbm_to_vmem [thread:$0]  %s52_s25, 64, %s54_s28, [#allocation7]  }
   0xe   :  { %s483_s10 = smov [#allocation11]  }
   0xf   :  { %s75_s11 = sshll.u32 %s483_s10, 4  ;;  %s76_s11 = int_to_ptr.vmem [resolvable:$true] %s75_s11 }
  0x10   :  { %78 = dma.hbm_to_vmem [thread:$0]  %s74_s0, 16, %s76_s11, [#allocation10]  }
  0x11   :  { %469 = dma.done.wait [#allocation4], 256  }
  0x12   :  { %470 = vsyncadd [#allocation4], 4294967040 }
  0x13   :  { %471 = dma.done.wait [#allocation7], 128  }
  0x14   :  { %472 = vsyncadd [#allocation7], 4294967168 }
  0x15   :  { %473 = dma.done.wait [#allocation10], 32  }
  0x16   :  { %474 = vsyncadd [#allocation10], 4294967264  ;;  %v109_v0 = vld [vmem:[#allocation3] sm:$0xff]  ;;  %v110_v1 = vld [vmem:[#allocation3 + $0x8] sm:$0xff]  ;;  %vm125_vm0 = vcmask 1043456   ;;  %vm107_vm1 = vcmask 25600   ;;  %v138_v15 = vlaneseq }
  0x17   :  { %114 = vst [vmem:[#allocation1] ss:$2 sm:$0xff] %v109_v0  ;;  %v484_v12 = vmov 0.0   ;;  %v153_v13 = vld [vmem:[#allocation6] sm:$0xf]  ;;  %vm142_vm2 = vcmask 1041409  }
  0x18   :  { %118 = vst [vmem:[#allocation1 + $0x10] ss:$2 sm:$0xff] %v110_v1  ;;  %300 = vmatpush.msk.msra.mxu0 %vm125_vm0, %v153_v13  ;;  %v139_v16 = vand.u32 127, %v138_v15  ;;  %vm158_vm3 = vcmask 31744   ;;  %v192_v25 = vld [vmem:[#allocation8] sm:$0xf] }
  0x19   :  { %108 = vst.msk [vmem:[#allocation2] sm:$0x3] %vm107_vm1, %v484_v12  ;;  %302 = vmatpush.msk.msra.mxu1 %vm125_vm0, %v192_v25  ;;  %v316_v26 = vld [vmem:[%s581_s2] ss:$0 sm:$0xff]  ;;  %v318_v33 = vld [vmem:[#allocation9] ss:$0 sm:$0xff] }
  0x1a   :  { %v317_v27 = vld [vmem:[%s582_s3] ss:$0 sm:$0xff]  ;;  %v319_v34 = vld [vmem:[#allocation11] ss:$0 sm:$0xff] }
  0x1b   :  { %v230_v32 = vld [vmem:[%s586_s7] sm:$0xf]  ;;  %s485_s7 = smov [#allocation12]  }
  0x1c   :  { %304 = vmatpush.msk.msra.mxu2 %vm125_vm0, %v230_v32  ;;  %v320_v39 = vld [vmem:[%s587_s8] ss:$0 sm:$0xff]  ;;  %s286_s16 = sshll.u32 %s485_s7, 4  ;;  %s288_s8 = sshll.u32 %s588_s9, 4  ;;  %s287_s16 = int_to_ptr.vmem [resolvable:$true] %s286_s16  ;;  %s289_s8 = int_to_ptr.hbm [resolvable:$true] %s288_s8 }
  0x1e   :  { %v115_v2 = vld.sshfl [vmem:[#allocation1] sm:$0xff pattern:$0x75316420]  ;;  %v116_v3 = vld.sshfl [vmem:[#allocation1 + $0x8] sm:$0xff pattern:$0x75316420] }
  0x1f   :  { %v126_v4 = vsel %vm125_vm0, %v115_v2, 0.0  ;;  %v127_v5 = vsel %vm125_vm0, %v116_v3, 0.0  ;;  %v119_v7 = vld.sshfl [vmem:[#allocation1 + $0x10] sm:$0xff pattern:$0x75316420] }
  0x20   :  { %v128_v6 = vadd.f32 %v127_v5, %v126_v4  ;;  %v120_v8 = vld.sshfl [vmem:[#allocation1 + $0x18] sm:$0xff pattern:$0x75316420]  ;;  %v131_v9 = vsel %vm125_vm0, %v119_v7, 0.0  ;;  %v111_v19 = vld [vmem:[#allocation2] sm:$0x3] }
  0x21   :  { %v132_v10 = vsel %vm125_vm0, %v120_v8, 0.0 }
  0x22   :  { %129 = vadd.xlane.f32.xlu0 %v128_v6  ;;  %v133_v11 = vadd.f32 %v132_v10, %v131_v9 }
  0x2a   :  { %134 = vadd.xlane.f32.xlu0 %v133_v11 }
  0x95   :  { %v130_v14 = vpop.xlane.xlu0 %129 }
  0x96   :  { %v140_v18 = vperm.slane %v130_v14, %v139_v16 }
  0x9d   :  { %v135_v17 = vpop.xlane.xlu0 %134 }
  0x9e   :  { %v141_v20 = vperm.slane %v135_v17, %v139_v16 }
  0xa0   :  { %v143_v21 = vsel %vm142_vm2, %v141_v20, %v140_v18 }
  0xa1   :  { %v145_v22 = vadd.f32 %v143_v21, %v111_v19 }
  0xa3   :  { %147 = vst.msk [vmem:[#allocation2] sm:$0x3] %vm107_vm1, %v145_v22 }
  0xaa   :  { %v151_v23 = vld [vmem:[#allocation2] sm:$0x3] }
  0xab   :  { %v152_v24 = vmul.f32 0.00390625, %v151_v23 }
  0xad   :  { %301 = vmatmul.msk.f32.vlgmr.msra.gmra.mxu0 %vm158_vm3, %v152_v24 }
 0x12a   :  { %v182_v28 = vpop.f32.mrf.mxu0 }
 0x12b   :  { %v183_v29 = vadd.f32 %v316_v26, %v182_v28 }
 0x12d   :  { %v190_v30 = vmul.f32 %v317_v27, %v183_v29  ;;  %vm185_vm4 = vcmp.ge.f32.partialorder %v183_v29, 0.0 }
 0x12f   :  { %v191_v31 = vsel %vm185_vm4, %v183_v29, %v190_v30 }
 0x130   :  { %303 = vmatmul.msk.f32.vlgmr.msra.gmra.mxu1 %vm158_vm3, %v191_v31 }
 0x1ad   :  { %v220_v35 = vpop.f32.mrf.mxu1 }
 0x1ae   :  { %v221_v36 = vadd.f32 %v318_v33, %v220_v35 }
 0x1b0   :  { %v228_v37 = vmul.f32 %v319_v34, %v221_v36  ;;  %vm223_vm5 = vcmp.ge.f32.partialorder %v221_v36, 0.0 }
 0x1b2   :  { %v229_v38 = vsel %vm223_vm5, %v221_v36, %v228_v37 }
 0x1b3   :  { %305 = vmatmul.msk.f32.vlgmr.msra.gmra.mxu2 %vm158_vm3, %v229_v38 }
 0x236   :  { %v258_v40 = vpop.f32.mrf.mxu2 }
 0x237   :  { %v259_v41 = vadd.f32 %v320_v39, %v258_v40 }
 0x239   :  { %v306_v42 = vmul.f32 -1.442695, %v259_v41 }
 0x23b   :  { %321 = vpow2.f32 %v306_v42 }
 0x241   :  { %v322_v43 = vpop.eup %321 }
 0x242   :  { %v264_v44 = vadd.f32 1.0, %v322_v43 }
 0x244   :  { %323 = vrcp.f32 %v264_v44  ;;  %v276_v48 = vand.u32 2147483648, %v264_v44  ;;  %v274_v50 = vand.u32 2147483647, %v264_v44  ;;  %vm270_vm7 = vweird.f32 %v264_v44 }
 0x246   :  { %v277_v52 = vor.u32 1.1754944e-38, %v276_v48  ;;  %vm275_vm9 = vcmp.eq.f32.partialorder %v274_v50, 8.507059e+37 }
 0x24a   :  { %v324_v45 = vpop.eup %323 }
 0x24b   :  { %v266_v46 = vmul.f32 %v324_v45, %v264_v44  ;;  %vm271_vm6 = vweird.f32 %v324_v45 }
 0x24c   :  { %vm272_vm8 = vmor %vm270_vm7, %vm271_vm6 }
 0x24d   :  { %v267_v47 = vsub.f32 1.0, %v266_v46 }
 0x24f   :  { %v268_v49 = vmul.f32 %v324_v45, %v267_v47 }
 0x251   :  { %v269_v51 = vadd.f32 %v324_v45, %v268_v49 }
 0x253   :  { %v273_v53 = vsel %vm272_vm8, %v324_v45, %v269_v51 }
 0x254   :  { %v278_v54 = vsel %vm275_vm9, %v277_v52, %v273_v53 }
 0x255   :  { %280 = vst.msk [vmem:[#allocation12] sm:$0x3] %vm107_vm1, %v278_v54 }
 0x256   :  { %291 = dma.vmem_to_hbm [thread:$0]  %s287_s16, 32, %s289_s8, [#allocation5]  }
 0x257   :  { %475 = dma.done.wait [#allocation5], 32  }
 0x258   :  { %476 = vsyncadd [#allocation5], 4294967264 }
 0x259   :  { %296 = vsyncpa [#allocation4], 1 }
 0x25a   :  { %297 = vsyncpa [#allocation7], 1 }
 0x25b   :  { %298 = vsyncpa [#allocation10], 1 }
 0x25c   :  { %299 = vsyncpa [#allocation5], 1 }

</bundles_post_ra>
